<compile_context>
chip_gen: v6e
topology: v6e:2x2x1
jax: 0.10.0
libtpu: 0.0.40
codegen_flags: <defaults>
</compile_context>

<pallas_src>
import functools

import jax
import jax.numpy as jnp
from jax.experimental import pallas as pl
from jax.experimental.pallas import tpu as pltpu


def _round_up(x, m):
    return ((x + m - 1) // m) * m


def _cdiv(a, b):
    return -(-a // b)


# ---------------------------------------------------------------------------
# Kernels
# ---------------------------------------------------------------------------

def _ffn_kernel_resident(x_ref, w1_ref, b1_ref, w2_ref, b2_ref, o_ref, *,
                         mxu_dtype):
    """Whole hidden dim resident in VMEM: one fused pass per M tile."""
    x = x_ref[...].astype(mxu_dtype)
    # fc1: (tm, E) @ (E, H) -> f32; bias + ReLU in f32.
    h = jnp.dot(x, w1_ref[...], preferred_element_type=jnp.float32)
    h = jnp.maximum(h + b1_ref[...], 0.0)
    # dropout(p=0.0) is the identity (eval semantics).
    # TODO(synk): no PRNG path for dropout p > 0 (training mode).
    # fc2: (tm, H) @ (H, E) -> f32; bias add, downcast, store.
    y = jnp.dot(h.astype(mxu_dtype), w2_ref[...],
                preferred_element_type=jnp.float32)
    o_ref[...] = (y + b2_ref[...]).astype(o_ref.dtype)


def _ffn_kernel_reduce(x_ref, w1_ref, b1_ref, w2_ref, b2_ref, o_ref, acc_ref,
                       *, mxu_dtype):
    """Hidden dim tiled (reduction axis) with an f32 VMEM accumulator."""
    k = pl.program_id(1)

    @pl.when(k == 0)
    def _():
        acc_ref[...] = jnp.zeros_like(acc_ref)

    x = x_ref[...].astype(mxu_dtype)
    h = jnp.dot(x, w1_ref[...], preferred_element_type=jnp.float32)
    h = jnp.maximum(h + b1_ref[...], 0.0)
    # dropout(p=0.0) identity.  TODO(synk): PRNG path for p > 0.
    acc_ref[...] += jnp.dot(h.astype(mxu_dtype), w2_ref[...],
                            preferred_element_type=jnp.float32)

    @pl.when(k == pl.num_programs(1) - 1)
    def _():
        o_ref[...] = (acc_ref[...] + b2_ref[...]).astype(o_ref.dtype)


# ---------------------------------------------------------------------------
# VMEM budgeting / tile selection (generation-aware: v5e / v6e / v7x)
# ---------------------------------------------------------------------------

def _vmem_limit_bytes():
    cap = 64 << 20                      # conservative (v7x-sized) fallback
    try:
        info = pltpu.get_tpu_info()
        cap = int(getattr(info, "vmem_capacity_bytes", cap) or cap)
    except Exception:
        pass
    # Leave headroom for Mosaic internal scratch; never request > 100 MiB.
    return min(cap * 3 // 4, 100 << 20)


def _select_tiles(M, E_p, H_p, x_bytes, out_bytes, w_bytes, budget):
    """Pick (tm, th, resident) under a VMEM byte budget.

    Per-step working set (double-buffered inputs/outputs, f32 accumulator):
      x/out tiles : tm * E_p * 2*(x_bytes + out_bytes) (+ tm*E_p*4 for the acc)
      W1/W2 tiles : th * E_p * 4 * w_bytes
    """
    per_row = E_p * (2 * x_bytes + 2 * out_bytes + 4)
    per_col = 4 * E_p * w_bytes

    def fits(tm, th):
        return tm * per_row + th * per_col <= budget

    # Megacore: keep at least two M tiles when M is large enough so both v7x
    # TensorCores get work; cap tm at 1024 rows.
    if M <= 8:
        tm_cap = _round_up(max(M, 1), 8)
    else:
        tm_cap = min(1024, _round_up(_cdiv(M, 2), 8))

    def max_tm(th):
        tm = tm_cap
        while tm > 8 and not fits(tm, th):
            tm = max(8, ((tm // 2) // 8) * 8)
        return tm

    # Plan A: weights fully resident -> fetched from HBM exactly once.
    if fits(8, H_p):
        return max_tm(H_p), H_p, True

    # Plan B: tile the hidden axis.  th must be a multiple of 128 that divides
    # H_p; then maximize tm since weight HBM traffic scales with M_p / tm.
    nb = H_p // 128
    th = 128
    for cand in (8, 4, 2, 1):
        if nb % cand == 0 and fits(8, cand * 128):
            th = cand * 128
            break
    return max_tm(th), th, False


# ---------------------------------------------------------------------------
# Public wrapper
# ---------------------------------------------------------------------------

def make_feed_forward(w1, b1, w2, b2, *, mxu_dtype=jnp.bfloat16,
                      interpret=False):
    """Build a jitted FFN forward for fixed weights.

    w1: (E, H) == fc1.weight.T, b1: (H,), w2: (H, E) == fc2.weight.T, b2: (E,).
    Weight padding / dtype cast happens once here, outside the hot path.
    """
    E, H = w1.shape
    assert w2.shape == (H, E) and b1.shape == (H,) and b2.shape == (E,)

    # Lane-dense padding (last dims multiples of 128).  Zero padding is exact
    # for relu(x@W1+b1)@W2+b2 and is sliced off after the kernel.
    E_p = _round_up(E, 128)
    H_p = _round_up(H, 128)

    w1_p = jnp.pad(jnp.asarray(w1), ((0, E_p - E), (0, H_p - H))).astype(mxu_dtype)
    w2_p = jnp.pad(jnp.asarray(w2), ((0, H_p - H), (0, E_p - E))).astype(mxu_dtype)
    b1_p = jnp.pad(jnp.asarray(b1), (0, H_p - H)).reshape(1, H_p).astype(jnp.float32)
    b2_p = jnp.pad(jnp.asarray(b2), (0, E_p - E)).reshape(1, E_p).astype(jnp.float32)

    vmem_limit = _vmem_limit_bytes()
    tile_budget = int(vmem_limit * 0.85)
    w_bytes = jnp.dtype(mxu_dtype).itemsize

    @jax.jit
    def fwd(x):
        B, S, E_in = x.shape
        assert E_in == E, f"expected embed dim {E}, got {E_in}"
        M = B * S
        dt = x.dtype
        x_bytes = jnp.dtype(dt).itemsize
        out_bytes = x_bytes

        tm, th, resident = _select_tiles(M, E_p, H_p, x_bytes, out_bytes,
                                         w_bytes, tile_budget)
        M_p = _round_up(M, tm)

        x2d = x.reshape(M, E)
        if M_p != M or E_p != E:
            x2d = jnp.pad(x2d, ((0, M_p - M), (0, E_p - E)))

        if resident:
            grid = (M_p // tm,)
            kernel = functools.partial(_ffn_kernel_resident, mxu_dtype=mxu_dtype)
            in_specs = [
                pl.BlockSpec((tm, E_p), lambda i: (i, 0)),    # x tile
                pl.BlockSpec((E_p, H_p), lambda i: (0, 0)),   # W1 (resident)
                pl.BlockSpec((1, H_p), lambda i: (0, 0)),     # b1 (resident)
                pl.BlockSpec((H_p, E_p), lambda i: (0, 0)),   # W2 (resident)
                pl.BlockSpec((1, E_p), lambda i: (0, 0)),     # b2 (resident)
            ]
            out_specs = pl.BlockSpec((tm, E_p), lambda i: (i, 0))
            scratch_shapes = []
            dim_sem = ("parallel",)
            weight_streams = 1
        else:
            grid = (M_p // tm, H_p // th)
            kernel = functools.partial(_ffn_kernel_reduce, mxu_dtype=mxu_dtype)
            in_specs = [
                pl.BlockSpec((tm, E_p), lambda i, k: (i, 0)),   # x (held over k)
                pl.BlockSpec((E_p, th), lambda i, k: (0, k)),   # W1 slab
                pl.BlockSpec((1, th), lambda i, k: (0, k)),     # b1 slab
                pl.BlockSpec((th, E_p), lambda i, k: (k, 0)),   # W2 slab
                pl.BlockSpec((1, E_p), lambda i, k: (0, 0)),    # b2
            ]
            out_specs = pl.BlockSpec((tm, E_p), lambda i, k: (i, 0))
            scratch_shapes = [pltpu.VMEM((tm, E_p), jnp.float32)]
            dim_sem = ("parallel", "arbitrary")
            weight_streams = M_p // tm      # W1/W2 re-streamed once per M tile

        cost = pl.CostEstimate(
            flops=4 * M_p * H_p * E_p,                              # 2 matmuls
            transcendentals=0,
            bytes_accessed=(M_p * E_p * x_bytes                        # x
                            + weight_streams * 2 * E_p * H_p * w_bytes  # W1+W2
                            + (H_p + E_p) * 4                           # biases
                            + M_p * E_p * out_bytes))                   # out

        out2d = pl.pallas_call(
            kernel,
            out_shape=jax.ShapeDtypeStruct((M_p, E_p), dt),
            grid_spec=pltpu.PrefetchScalarGridSpec(
                num_scalar_prefetch=0,
                grid=grid,
                in_specs=in_specs,
                out_specs=out_specs,
                scratch_shapes=scratch_shapes,
            ),
            compiler_params=pltpu.CompilerParams(
                dimension_semantics=dim_sem,
                vmem_limit_bytes=vmem_limit),
            cost_estimate=cost,
            interpret=interpret,
        )(x2d, w1_p, b1_p, w2_p, b2_p)

        return out2d[:M, :E].reshape(B, S, E)

    return fwd


def _init_linear(key, in_features, out_features, dtype=jnp.float32):
    """Deterministic init mimicking nn.Linear default (uniform +-1/sqrt(in))."""
    kw, kb = jax.random.split(key)
    bound = 1.0 / jnp.sqrt(jnp.float32(in_features))
    # PyTorch stores weight as (out, in); transpose when handing to the kernel.
    w = jax.random.uniform(kw, (out_features, in_features), dtype,
                           minval=-bound, maxval=bound)
    b = jax.random.uniform(kb, (out_features,), dtype,
                           minval=-bound, maxval=bound)
    return w, b


if __name__ == "__main__":
    embed_size = 32
    hidden = 64
    B, S = 2, 8

    key = jax.random.PRNGKey(0)
    kx, k1, k2 = jax.random.split(key, 3)

    x = jax.random.normal(kx, (B, S, embed_size), dtype=jnp.float32)
    w1_t, b1 = _init_linear(k1, embed_size, hidden)   # fc1.weight: (H, E)
    w2_t, b2 = _init_linear(k2, hidden, embed_size)   # fc2.weight: (E, H)

    # Kernel expects (in, out) weights; weight prep happens once in the factory.
    ffn = make_feed_forward(w1_t.T, b1, w2_t.T, b2)
    out = jax.block_until_ready(ffn(x))

    # Reference (same math as the PyTorch forward with dropout p=0), f32.
    ref = jnp.maximum(x @ w1_t.T + b1, 0.0) @ w2_t.T + b2
    assert out.shape == ref.shape
    # bf16 MXU matmuls with f32 accumulation -> bf16-level tolerance.
    err = float(jnp.max(jnp.abs(out - ref)))
    assert jnp.allclose(out, ref, atol=2e-2, rtol=2e-2), f"max abs err {err}"

    print("KERNEL_OK")
</pallas_src>

<mosaic_0001>
module attributes {stable_mosaic.version = 11 : i64} {
  func.func @_ffn_kernel_resident(%arg0: i32, %arg1: memref<8x128xf32, #tpu.memory_space<vmem>>, %arg2: memref<128x128xbf16, #tpu.memory_space<vmem>>, %arg3: memref<1x128xf32, #tpu.memory_space<vmem>>, %arg4: memref<128x128xbf16, #tpu.memory_space<vmem>>, %arg5: memref<1x128xf32, #tpu.memory_space<vmem>>, %arg6: memref<8x128xf32, #tpu.memory_space<vmem>>) attributes {dimension_semantics = [#tpu.dimension_semantics<parallel>], iteration_bounds = array<i64: 2>, scalar_prefetch = 0 : i64, scratch_operands = 0 : i64, tpu.core_type = #tpu.core_type<tc>, window_params = [{transform_indices = @transform_0, window_bounds = array<i64: 8, 128>}, {pipeline_mode = #tpu.pipeline_mode<synchronous>, transform_indices = @transform_1, window_bounds = array<i64: 128, 128>}, {pipeline_mode = #tpu.pipeline_mode<synchronous>, transform_indices = @transform_2, window_bounds = array<i64: 1, 128>}, {pipeline_mode = #tpu.pipeline_mode<synchronous>, transform_indices = @transform_3, window_bounds = array<i64: 128, 128>}, {pipeline_mode = #tpu.pipeline_mode<synchronous>, transform_indices = @transform_4, window_bounds = array<i64: 1, 128>}, {transform_indices = @transform_5, window_bounds = array<i64: 8, 128>}]} {
    %c0 = arith.constant 0 : index
    %c0_0 = arith.constant 0 : index
    %0 = vector.load %arg1[%c0, %c0_0] : memref<8x128xf32, #tpu.memory_space<vmem>>, vector<8x128xf32>
    %1 = arith.truncf %0 : vector<8x128xf32> to vector<8x128xbf16>
    %c0_1 = arith.constant 0 : index
    %c0_2 = arith.constant 0 : index
    %2 = vector.load %arg2[%c0_1, %c0_2] : memref<128x128xbf16, #tpu.memory_space<vmem>>, vector<128x128xbf16>
    %cst = arith.constant dense<0.000000e+00> : vector<8x128xf32>
    %3 = tpu.matmul %1, %2, %cst {dimension_numbers = #tpu.dot_dimension_numbers<[1], [0], [0], [1], [0, 0, 1, 1], [], []>} : vector<8x128xbf16>, vector<128x128xbf16>, vector<8x128xf32> -> vector<8x128xf32>
    %c0_3 = arith.constant 0 : index
    %c0_4 = arith.constant 0 : index
    %4 = vector.load %arg3[%c0_3, %c0_4] : memref<1x128xf32, #tpu.memory_space<vmem>>, vector<1x128xf32>
    %5 = vector.broadcast %4 : vector<1x128xf32> to vector<8x128xf32>
    %6 = arith.addf %3, %5 : vector<8x128xf32>
    %cst_5 = arith.constant 0.000000e+00 : f32
    %7 = vector.broadcast %cst_5 : f32 to vector<8x128xf32>
    %8 = arith.maximumf %6, %7 : vector<8x128xf32>
    %9 = arith.truncf %8 : vector<8x128xf32> to vector<8x128xbf16>
    %c0_6 = arith.constant 0 : index
    %c0_7 = arith.constant 0 : index
    %10 = vector.load %arg4[%c0_6, %c0_7] : memref<128x128xbf16, #tpu.memory_space<vmem>>, vector<128x128xbf16>
    %cst_8 = arith.constant dense<0.000000e+00> : vector<8x128xf32>
    %11 = tpu.matmul %9, %10, %cst_8 {dimension_numbers = #tpu.dot_dimension_numbers<[1], [0], [0], [1], [0, 0, 1, 1], [], []>} : vector<8x128xbf16>, vector<128x128xbf16>, vector<8x128xf32> -> vector<8x128xf32>
    %c0_9 = arith.constant 0 : index
    %c0_10 = arith.constant 0 : index
    %12 = vector.load %arg5[%c0_9, %c0_10] : memref<1x128xf32, #tpu.memory_space<vmem>>, vector<1x128xf32>
    %13 = vector.broadcast %12 : vector<1x128xf32> to vector<8x128xf32>
    %14 = arith.addf %11, %13 : vector<8x128xf32>
    %c0_11 = arith.constant 0 : index
    %c0_12 = arith.constant 0 : index
    %15 = vector.load %arg6[%c0_11, %c0_12] : memref<8x128xf32, #tpu.memory_space<vmem>>, vector<8x128xf32>
    tpu.vector_store %arg6[%c0_11, %c0_12], %14 {strides = array<i32>} : memref<8x128xf32, #tpu.memory_space<vmem>>, vector<8x128xf32>,
    return
  }
  func.func @transform_0(%arg0: i32) -> (i32, i32) {
    %c0_i32 = arith.constant 0 : i32
    %c0_i32_0 = arith.constant 0 : i32
    return %arg0, %c0_i32 : i32, i32
  }
  func.func @transform_1(%arg0: i32) -> (i32, i32) {
    %c0_i32 = arith.constant 0 : i32
    %c0_i32_0 = arith.constant 0 : i32
    %c0_i32_1 = arith.constant 0 : i32
    return %c0_i32, %c0_i32_0 : i32, i32
  }
  func.func @transform_2(%arg0: i32) -> (i32, i32) {
    %c0_i32 = arith.constant 0 : i32
    %c0_i32_0 = arith.constant 0 : i32
    %c0_i32_1 = arith.constant 0 : i32
    return %c0_i32, %c0_i32_0 : i32, i32
  }
  func.func @transform_3(%arg0: i32) -> (i32, i32) {
    %c0_i32 = arith.constant 0 : i32
    %c0_i32_0 = arith.constant 0 : i32
    %c0_i32_1 = arith.constant 0 : i32
    return %c0_i32, %c0_i32_0 : i32, i32
  }
  func.func @transform_4(%arg0: i32) -> (i32, i32) {
    %c0_i32 = arith.constant 0 : i32
    %c0_i32_0 = arith.constant 0 : i32
    %c0_i32_1 = arith.constant 0 : i32
    return %c0_i32, %c0_i32_0 : i32, i32
  }
  func.func @transform_5(%arg0: i32) -> (i32, i32) {
    %c0_i32 = arith.constant 0 : i32
    %c0_i32_0 = arith.constant 0 : i32
    return %arg0, %c0_i32 : i32, i32
  }
}

</mosaic_0001>

<bundles_post_ra>
// kernel: fwd.1
= control target key start
LH: loop header
LB: loop body
LE: loop exit
PB: predicated region body
PF: predicated region fallthrough
CT: control target
= control target key end

     0   :  { %10 = vsyncpa [#allocation3], 0  ;;  %s870_s0 = inlined_call_operand.vmem [shape: f32[16,128], index: 0, kind: input, shape index: {}]   ;;  %s871_s1 = inlined_call_operand.hbm [shape: bf16[128,128], index: 1, kind: input, shape index: {}]   ;;  %s872_s2 = inlined_call_operand.vmem [shape: f32[1,128], index: 2, kind: input, shape index: {}]   ;;  %s873_s3 = inlined_call_operand.hbm [shape: bf16[128,128], index: 3, kind: input, shape index: {}]   ;;  %s874_s4 = inlined_call_operand.vmem [shape: f32[1,128], index: 4, kind: input, shape index: {}]   ;;  %s875_s5 = inlined_call_operand.vmem [shape: f32[16,128], index: 5, kind: output, shape index: {}]  }
   0x1   :  { %11 = vsyncpa [#allocation5], 0  ;;  %s795_s18 = smov 0  }
   0x2 LB: > { %s801_s19 = sadd.s32 4294967295, %s757_s18   ;;  %p555_p0 = scmp.ge.s32.totalorder %s757_s18, 1  ;;  %s757_s18 = sphi %s795_s18, %s17_s18  }
   0x3   : > { %p158_p1 = scmp.lt.s32.totalorder %s757_s18, 3  ;;  %s759_s20 = smov [#allocation2]  }
   0x4   : > { %s170_s21 = sshll.u32 %s759_s20, 4  ;;  %p657_p3 = scmp.eq.s32.totalorder %s801_s19, 0  ;;  %s171_s21 = int_to_ptr.vmem [resolvable:$true] %s170_s21 }
   0x5   : > { %p805_p2 = pnand %p555_p0, %p158_p1  ;;  %s760_s23 = smov [#allocation4]  }
   0x6   : > { %s186_s24 = sshll.u32 %s760_s23, 4  ;;  %s702_s26 = scalar_lea.vmem %s171_s21, 1024  ;;  %s187_s24 = int_to_ptr.vmem [resolvable:$true] %s186_s24 }
   0x7   : > { %p650_p4 = pneg %p805_p2  ;;  %p703_p7 = scmp.ne.s32.totalorder %s171_s21, %s702_s26 }
   0x8   : > { %p710_p10 = scmp.lt.s32.totalorder %s171_s21, %s171_s21  ;;  %p711_p11 = scmp.lt.s32.totalorder %s702_s26, %s702_s26 }
   0x9   : > { %p814_p5 = pnand %p657_p3, %p650_p4 }
   0xa   : > { %p712_p12 = por %p711_p11, %p710_p10 }
   0xb   : > { %p693_p6 = pneg %p814_p5 }
   0xd   : > { %p705_p8 = pnand %p703_p7, %p693_p6 }
   0xf   : > { %p706_p9 = pneg %p705_p8 }
  0x11   : > { %p713_p13 = pnand %p712_p12, %p706_p9 }
  0x13   : > { %716 = shalt.err (!%p713_p13)
}
  0x14   : > { %s761_s27 = smov 64   ;;  %s762_s28 = smov 4  }
  0x15   : > { %653 = dma.hbm_to_vmem [thread:$0]  (!%p814_p5), %s871_s1, 1024, %s171_s21, [#allocation3], %s761_s27, %s761_s27, %s762_s28  }
  0x16   : > { %s728_s6 = scalar_lea.vmem %s187_s24, 1024  ;;  %p736_p7 = scmp.lt.s32.totalorder %s187_s24, %s187_s24 }
  0x17   : > { %p729_p0 = scmp.ne.s32.totalorder %s187_s24, %s728_s6  ;;  %p737_p8 = scmp.lt.s32.totalorder %s728_s6, %s728_s6 }
  0x19   : > { %p731_p1 = pnand %p729_p0, %p693_p6  ;;  %p738_p10 = por %p737_p8, %p736_p7 }
  0x1b   : > { %p732_p4 = pneg %p731_p1 }
  0x1d   : > { %p739_p9 = pnand %p738_p10, %p732_p4 }
  0x1f   : > { %742 = shalt.err (!%p739_p9)
}
  0x20   : > { %656 = dma.hbm_to_vmem [thread:$0]  (!%p814_p5), %s873_s3, 1024, %s187_s24, [#allocation5], %s761_s27, %s761_s27, %s762_s28  }
  0x21   : > { %212 = sbr.rel (%p805_p2) target bundleno = 473 (0x1d9), region = 40 }
  0x26   : > { %748 = dma.done.wait (%p657_p3), [#allocation3], 1024  }
  0x27   : > { %750 = vsyncadd (%p657_p3), [#allocation3], 4294966272 }
  0x28   : > { %752 = dma.done.wait (%p657_p3), [#allocation5], 1024  }
  0x29   : > { %754 = vsyncadd (%p657_p3), [#allocation5], 4294966272  ;;  %v763_v0 = vmov 0.0   ;;  %vm764_vm0 = vmmov 0   ;;  %v675_v1 = vld [vmem:[#allocation2 + $0x38] sm:$0xff]   ;;  %v676_v2 = vld [vmem:[#allocation2 + $0x30] sm:$0xff]  }
  0x2a   : > { %602 = vmatprep.subr.bf16.mxu0 %v763_v0  ;;  %618 = vmatprep.mubr.msk.bf16.mxu0 %vm764_vm0, %v763_v0  ;;  %v677_v3 = vld [vmem:[#allocation2 + $0x28] sm:$0xff]   ;;  %v683_v4 = vld [vmem:[#allocation4 + $0x38] sm:$0xff]   ;;  %v678_v5 = vld [vmem:[#allocation2 + $0x20] sm:$0xff]   ;;  %p242_p2 = scmp.lt.s32.totalorder %s801_s19, 1 }
  0x2b   : > { %622 = vmatprep.subr.bf16.mxu1 %v763_v0  ;;  %638 = vmatprep.mubr.msk.bf16.mxu1 %vm764_vm0, %v763_v0  ;;  %v684_v6 = vld [vmem:[#allocation4 + $0x30] sm:$0xff]   ;;  %v679_v7 = vld [vmem:[#allocation2 + $0x18] sm:$0xff]   ;;  %v685_v8 = vld [vmem:[#allocation4 + $0x28] sm:$0xff]  }
  0x2c   : > { %603 = vmatpush3.bf16.msra.mxu0 %v675_v1  ;;  %623 = vmatpush3.bf16.msra.mxu1 %v683_v4  ;;  %s879_s19 = smov (!%p242_p2, %s801_s19), 1  ;;  %v680_v9 = vld [vmem:[#allocation2 + $0x10] sm:$0xff]   ;;  %v686_v10 = vld [vmem:[#allocation4 + $0x20] sm:$0xff]   ;;  %v681_v11 = vld [vmem:[#allocation2 + $0x8] sm:$0xff]  }
  0x2d   : > { %604 = vmatprep.subr.bf16.mxu0 %v763_v0  ;;  %624 = vmatprep.subr.bf16.mxu1 %v763_v0  ;;  %s562_s9 = sshll.u32 %s879_s19, 3  ;;  %v687_v12 = vld [vmem:[#allocation4 + $0x18] sm:$0xff]   ;;  %v682_v13 = vld [vmem:[#allocation2] sm:$0xff]   ;;  %v688_v15 = vld [vmem:[#allocation4 + $0x10] sm:$0xff]  }
  0x2e   : > { %s245_s12 = scalar_lea.vmem %s870_s0, %s562_s9  ;;  %v689_v17 = vld [vmem:[#allocation4 + $0x8] sm:$0xff]   ;;  %v690_v18 = vld [vmem:[#allocation4] sm:$0xff]   ;;  %s249_s21 = scalar_lea.vmem %s875_s5, %s562_s9 }
  0x2f   : > { %v251_v14 = vld [vmem:[%s245_s12] sm:$0xff] }
  0x30   : > { %605 = vmatpush3.bf16.msra.mxu0 %v676_v2  ;;  %625 = vmatpush3.bf16.msra.mxu1 %v684_v6  ;;  %v252_v16 = vpack.c.bf16 %v251_v14, %v251_v14  ;;  %v564_v19 = vld [vmem:[%s872_s2] ss:$0 sm:$0xff] }
  0x31   : > { %606 = vmatprep.subr.bf16.mxu0 %v763_v0  ;;  %626 = vmatprep.subr.bf16.mxu1 %v763_v0  ;;  %v573_v27 = vld [vmem:[%s874_s4] ss:$0 sm:$0xff] }
  0x34   : > { %607 = vmatpush3.bf16.msra.mxu0 %v677_v3  ;;  %627 = vmatpush3.bf16.msra.mxu1 %v685_v8 }
  0x35   : > { %608 = vmatprep.subr.bf16.mxu0 %v763_v0  ;;  %628 = vmatprep.subr.bf16.mxu1 %v763_v0 }
  0x38   : > { %609 = vmatpush3.bf16.msra.mxu0 %v678_v5  ;;  %629 = vmatpush3.bf16.msra.mxu1 %v686_v10 }
  0x39   : > { %610 = vmatprep.subr.bf16.mxu0 %v763_v0  ;;  %630 = vmatprep.subr.bf16.mxu1 %v763_v0 }
  0x3c   : > { %611 = vmatpush3.bf16.msra.mxu0 %v679_v7  ;;  %631 = vmatpush3.bf16.msra.mxu1 %v687_v12 }
  0x3d   : > { %612 = vmatprep.subr.bf16.mxu0 %v763_v0  ;;  %632 = vmatprep.subr.bf16.mxu1 %v763_v0 }
  0x40   : > { %613 = vmatpush3.bf16.msra.mxu0 %v680_v9  ;;  %633 = vmatpush3.bf16.msra.mxu1 %v688_v15 }
  0x41   : > { %614 = vmatprep.subr.bf16.mxu0 %v763_v0  ;;  %634 = vmatprep.subr.bf16.mxu1 %v763_v0 }
  0x44   : > { %615 = vmatpush3.bf16.msra.mxu0 %v681_v11  ;;  %635 = vmatpush3.bf16.msra.mxu1 %v689_v17 }
  0x45   : > { %616 = vmatprep.subr.bf16.mxu0 %v763_v0  ;;  %636 = vmatprep.subr.bf16.mxu1 %v763_v0 }
  0x48   : > { %617 = vmatpush3.bf16.msra.mxu0 %v682_v13  ;;  %637 = vmatpush3.bf16.msra.mxu1 %v690_v18 }
  0x4b   : > { %619 = vmatmul.mubr.bf16.vlgmr.msra.gmra.mxu0 %v252_v16 }
 0x10b   : > { %v358_v20 = vpop.f32.mrf.mxu0 }
 0x10c   : > { %v359_v21 = vadd.f32 %v564_v19, %v358_v20 }
 0x10d   : > { %v620_v22 = vpop.f32.mrf.mxu0 }
 0x10e   : > { %v364_v23 = vmax.f32 %v359_v21, 0.0 }
 0x10f   : > { %v361_v24 = vpop.f32.mrf.mxu0 }
 0x110   : > { %v365_v25 = vpack.c.bf16 %v364_v23, %v364_v23 }
 0x111   : > { %v621_v26 = vpop.f32.mrf.mxu0 }
 0x112   : > { %639 = vmatmul.mubr.bf16.vlgmr.msra.gmra.mxu1 %v365_v25 }
 0x1d2   : > { %v471_v28 = vpop.f32.mrf.mxu1 }
 0x1d3   : > { %v472_v29 = vadd.f32 %v573_v27, %v471_v28 }
 0x1d4   : > { %v640_v30 = vpop.f32.mrf.mxu1 }
 0x1d5   : > { %477 = vst [vmem:[%s249_s21] sm:$0xff] %v472_v29 }
 0x1d6   : > { %v474_v31 = vpop.f32.mrf.mxu1 }
 0x1d8   : > { %v641_v32 = vpop.f32.mrf.mxu1 }
 0x1d9 PF: > { %s17_s18 = sadd.s32 1, %s757_s18  }
 0x1da   : > { %p14_p3 = scmp.ge.s32.totalorder %s17_s18, 4  }
 0x1dc   :  { %16 = sbr.rel (!%p14_p3) target bundleno = 2 (0x2), region = 79 }
 0x1e1   :  { %497 = vsyncpa [#allocation3], 1 }
 0x1e2   :  { %499 = vsyncpa [#allocation3 + $0x1], 1 }
 0x1e3   :  { %500 = vsyncpa [#allocation5], 1 }

</bundles_post_ra>
